<compile_context>
chip_gen: v7x
topology: tpu7x:2x2x1
jax: 0.10.0
libtpu: 0.0.40
codegen_flags: <defaults>
</compile_context>

<pallas_src>
import math

import jax
import jax.numpy as jnp
from jax.experimental import pallas as pl
from jax.experimental.pallas import tpu as pltpu

_VMEM_LIMIT_BYTES = 48 * 1024 * 1024  # < 64 MiB physical on v7x, plenty on v5e/v6e


# ---------------------------------------------------------------------------
# Path 1: zero-copy flatten (alias input buffer to output, no data movement).
# ---------------------------------------------------------------------------
def _alias_kernel(x_ref, o_ref):
    # input_output_aliases={0: 0} makes o_ref the same HBM buffer as x_ref,
    # which already holds the row-major (B, -1) data after the wrapper's
    # metadata-only reshape.  Nothing to move; just pin the output ref.
    del x_ref
    pltpu.touch(o_ref)


def _flatten_alias(x2):
    return pl.pallas_call(
        _alias_kernel,
        out_shape=jax.ShapeDtypeStruct(x2.shape, x2.dtype),
        in_specs=[pl.BlockSpec(memory_space=pl.ANY)],
        out_specs=pl.BlockSpec(memory_space=pl.ANY),
        input_output_aliases={0: 0},
        compiler_params=pltpu.CompilerParams(has_side_effects=True),
    )(x2)


# ---------------------------------------------------------------------------
# Path 2: explicit lane-dense tiled copy (robust fallback).
# ---------------------------------------------------------------------------
def _copy_kernel(x_ref, o_ref):
    # Pure lane-dense VMEM copy; the flatten itself is a free wrapper reshape.
    o_ref[...] = x_ref[...]


def _sublane_base(dtype):
    # Sub-32-bit dtypes pack along sublanes: f32 -> 8, bf16 -> 16, int8 -> 32.
    itemsize = jnp.dtype(dtype).itemsize
    return 8 * max(1, 4 // itemsize)


def _largest_multiple_divisor(n, base, cap):
    """Largest t <= cap with t % base == 0 and n % t == 0 (0 if none)."""
    if n % base != 0:
        return 0
    cap = max(base, min(n, cap))
    best = base
    t = base
    while t <= cap:
        if n % t == 0:
            best = t
        t += base
    return best


def _choose_slab(n, sublane_base):
    """Factor n == R*C with C a big multiple of 128, preferring full vregs."""
    if n % 128 != 0:
        return None
    # Wide, contiguous rows, but leave >= sublane_base rows when possible so
    # vregs are fully populated regardless of the batch size.
    lane_cap = min(512 * 128, max(128, n // sublane_base))
    c = _largest_multiple_divisor(n, 128, lane_cap)
    if c == 0:
        return None
    return n // c, c


def _tiled_copy_2d(x2, target_block_bytes, sublane_base, min_grid_steps=8):
    r, c = x2.shape
    itemsize = jnp.dtype(x2.dtype).itemsize
    total_bytes = r * c * itemsize

    # Big blocks amortize the ~0.35 us per-grid-step overhead, but cap so large
    # tensors keep >= min_grid_steps steps (pipeline overlap, both v7x TCs).
    eff_target = min(target_block_bytes,
                     max(512 * 1024, total_bytes // min_grid_steps))

    # Columns first (lane-dense, contiguous full-width rows are the big lever).
    col_budget = max(128, eff_target // (sublane_base * itemsize))
    if c <= col_budget:
        tile_c = c                                   # full extent: always legal
    else:
        tile_c = (col_budget // 128) * 128           # 128-multiple, cdiv-masked edge

    # Rows from the remaining budget, multiple of the dtype's sublane packing.
    row_budget = max(1, eff_target // (tile_c * itemsize))
    if r <= row_budget:
        tile_r = r                                   # full extent: always legal
    else:
        tile_r = max(sublane_base, (row_budget // sublane_base) * sublane_base)
        if tile_r > r:
            tile_r = r                               # full extent: always legal

    grid = (pl.cdiv(r, tile_r), pl.cdiv(c, tile_c))

    return pl.pallas_call(
        _copy_kernel,
        out_shape=jax.ShapeDtypeStruct((r, c), x2.dtype),
        grid_spec=pltpu.PrefetchScalarGridSpec(
            num_scalar_prefetch=0,
            grid=grid,
            in_specs=[pl.BlockSpec((tile_r, tile_c), lambda i, j: (i, j))],
            out_specs=pl.BlockSpec((tile_r, tile_c), lambda i, j: (i, j)),
        ),
        compiler_params=pltpu.CompilerParams(
            # Every block is independent (pure copy) -> both axes parallel so
            # v7x's two TensorCores split the work; harmless on v5e/v6e.
            dimension_semantics=("parallel", "parallel"),
            vmem_limit_bytes=_VMEM_LIMIT_BYTES,
        ),
    )(x2)


# ---------------------------------------------------------------------------
# Public wrapper: Flatten.forward(x) == x.view(x.size(0), -1)
# ---------------------------------------------------------------------------
def flatten(x, *, zero_copy=True, target_block_bytes=8 * 1024 * 1024):
    """Pallas equivalent of Flatten.forward: x.view(x.size(0), -1)."""
    b = x.shape[0]
    flat = math.prod(x.shape[1:]) if x.ndim > 1 else 1

    if zero_copy:
        try:
            # Row-major flatten of a contiguous array == torch .view(B, -1);
            # this reshape is metadata-only, and the kernel aliases the buffer.
            out = _flatten_alias(x.reshape(b, flat))
            jax.block_until_ready(out)  # surface any dispatch/runtime rejection here
            return out
        except Exception:
            pass  # fall back to the explicit tiled-copy kernel below

    sublane = _sublane_base(x.dtype)
    n = b * flat
    slab = _choose_slab(n, sublane)
    if slab is not None and slab != (b, flat):
        r, c = slab
        # Dense slab view (metadata-only), copy, then view back to (B, -1).
        out = _tiled_copy_2d(x.reshape(r, c), target_block_bytes, sublane)
        return out.reshape(b, flat)
    return _tiled_copy_2d(x.reshape(b, flat), target_block_bytes, sublane)


if __name__ == "__main__":
    key = jax.random.PRNGKey(0)

    # Small NCHW input consistent with a conv-feature-map flatten, plus an
    # odd-shaped input to exercise the non-128-multiple fallback path.
    shapes = [(2, 4, 16, 16), (3, 5, 7)]
    for shape in shapes:
        x = jax.random.normal(key, shape, dtype=jnp.float32)
        ref = x.reshape(x.shape[0], -1)  # == torch .view(B, -1) (contiguous)

        out_alias = flatten(x)                  # zero-copy (aliased) path
        out_copy = flatten(x, zero_copy=False)  # explicit tiled-copy path
        jax.block_until_ready(out_alias)
        jax.block_until_ready(out_copy)

        for out in (out_alias, out_copy):
            assert out.shape == ref.shape, (out.shape, ref.shape)
            assert out.dtype == ref.dtype
            assert jnp.array_equal(out, ref)

    print("KERNEL_OK")
</pallas_src>

<mosaic_0001>
module attributes {stable_mosaic.version = 11 : i64} {
  func.func @_alias_kernel(%arg0: memref<2x1024xf32, #tpu.memory_space<any>>, %arg1: memref<2x1024xf32, #tpu.memory_space<any>>) attributes {dimension_semantics = [], scalar_prefetch = 0 : i64, scratch_operands = 0 : i64, tpu.core_type = #tpu.core_type<tc>} {
    return
  }
}

module attributes {stable_mosaic.version = 11 : i64} {
  func.func @_copy_kernel(%arg0: i32, %arg1: i32, %arg2: memref<8x256xf32, #tpu.memory_space<vmem>>, %arg3: memref<8x256xf32, #tpu.memory_space<vmem>>) attributes {dimension_semantics = [#tpu.dimension_semantics<parallel>, #tpu.dimension_semantics<parallel>], iteration_bounds = array<i64: 1, 1>, scalar_prefetch = 0 : i64, scratch_operands = 0 : i64, tpu.core_type = #tpu.core_type<tc>, window_params = [{transform_indices = @transform_0, window_bounds = array<i64: 8, 256>}, {transform_indices = @transform_1, window_bounds = array<i64: 8, 256>}]} {
    %c0 = arith.constant 0 : index
    %c0_0 = arith.constant 0 : index
    %0 = vector.load %arg2[%c0, %c0_0] : memref<8x256xf32, #tpu.memory_space<vmem>>, vector<8x256xf32>
    %c0_1 = arith.constant 0 : index
    %c0_2 = arith.constant 0 : index
    %1 = vector.load %arg3[%c0_1, %c0_2] : memref<8x256xf32, #tpu.memory_space<vmem>>, vector<8x256xf32>
    tpu.vector_store %arg3[%c0_1, %c0_2], %0 {strides = array<i32>} : memref<8x256xf32, #tpu.memory_space<vmem>>, vector<8x256xf32>,
    return
  }
  func.func @transform_0(%arg0: i32, %arg1: i32) -> (i32, i32) {
    %c0_i32 = arith.constant 0 : i32
    return %arg0, %arg1 : i32, i32
  }
  func.func @transform_1(%arg0: i32, %arg1: i32) -> (i32, i32) {
    %c0_i32 = arith.constant 0 : i32
    return %arg0, %arg1 : i32, i32
  }
}

</mosaic_0001>

<bundles_post_ra>
// kernel: tpu_custom_call.1
= control target key start
LH: loop header
LB: loop body
LE: loop exit
PB: predicated region body
PF: predicated region fallthrough
CT: control target
= control target key end

     0   :  { %s16_s0 = inlined_call_operand.hbm [shape: f32[2,1024], index: 0, kind: input, shape index: {}, may-alias: {0,1}]   ;;  %s17_s1 = inlined_call_operand.hbm [shape: f32[2,1024], index: 1, kind: output, shape index: {}, may-alias: {0,1}]  }

// kernel: tpu_custom_call.1
= control target key start
LH: loop header
LB: loop body
LE: loop exit
PB: predicated region body
PF: predicated region fallthrough
CT: control target
= control target key end

     0   :  { %6 = vsyncpa [#allocation3], 0  ;;  %s126_s0 = inlined_call_operand.hbm [shape: f32[8,256], index: 0, kind: input, shape index: {}]   ;;  %s127_s1 = inlined_call_operand.hbm [shape: f32[8,256], index: 1, kind: output, shape index: {}]  }
   0x1   :  { %7 = vsyncpa [#allocation4], 0  ;;  %s90_s6 = smov [#allocation2]   ;;  %s42_s10 = scalar_lea.hbm %s126_s0, 256 }
   0x2   :  { %s14_s7 = sshll.u32 %s90_s6, 4  ;;  %p43_p0 = scmp.ne.s32.totalorder %s126_s0, %s42_s10  ;;  %s15_s7 = int_to_ptr.vmem [resolvable:$true] %s14_s7 }
   0x3   :  { %p46_p1 = scmp.lt.u32.totalorder %s42_s10, %s126_s0 }
   0x5   :  { %p48_p2 = pnand %p46_p1, %p43_p0 }
   0x7   :  { %51 = shalt.err (!%p48_p2)
}
   0x8   :  { %s52_s15 = scalar_lea.vmem %s15_s7, 256  ;;  %p57_p4 = scmp.lt.s32.totalorder %s15_s7, %s15_s7 }
   0x9   :  { %p53_p3 = scmp.ne.s32.totalorder %s15_s7, %s52_s15  ;;  %p58_p5 = scmp.lt.s32.totalorder %s52_s15, %s52_s15 }
   0xb   :  { %p59_p6 = por %p58_p5, %p57_p4 }
   0xd   :  { %p60_p7 = pnand %p59_p6, %p53_p3 }
   0xf   :  { %63 = shalt.err (!%p60_p7)
}
  0x10   :  { %17 = dma.hbm_to_vmem [thread:$0]  %s126_s0, 256, %s15_s7, [#allocation3]  }
  0x11   :  { %86 = dma.done.wait [#allocation3], 256  }
  0x12   :  { %87 = vsyncadd [#allocation3], 4294967040  ;;  %s91_s18 = smov [#allocation5]   ;;  %v21_v0 = vld [vmem:[#allocation2] sm:$0xff]  ;;  %v22_v1 = vld [vmem:[#allocation2 + $0x8] sm:$0xff] }
  0x13   :  { %s31_s19 = sshll.u32 %s91_s18, 4  ;;  %23 = vst [vmem:[#allocation5] sm:$0xff] %v21_v0  ;;  %24 = vst [vmem:[#allocation5 + $0x8] sm:$0xff] %v22_v1  ;;  %s32_s19 = int_to_ptr.vmem [resolvable:$true] %s31_s19 }
  0x14   :  { %s64_s20 = scalar_lea.vmem %s32_s19, 256  ;;  %p69_p9 = scmp.lt.s32.totalorder %s32_s19, %s32_s19 }
  0x15   :  { %p65_p8 = scmp.ne.s32.totalorder %s32_s19, %s64_s20  ;;  %p70_p10 = scmp.lt.s32.totalorder %s64_s20, %s64_s20 }
  0x17   :  { %p71_p11 = por %p70_p10, %p69_p9 }
  0x19   :  { %p72_p12 = pnand %p71_p11, %p65_p8 }
  0x1b   :  { %75 = shalt.err (!%p72_p12)
}
  0x1c   :  { %s76_s0 = scalar_lea.hbm %s127_s1, 256 }
  0x1d   :  { %p77_p13 = scmp.ne.s32.totalorder %s127_s1, %s76_s0  ;;  %p80_p0 = scmp.lt.u32.totalorder %s76_s0, %s127_s1 }
  0x1f   :  { %p82_p1 = pnand %p80_p0, %p77_p13 }
  0x21   :  { %85 = shalt.err (!%p82_p1)
}
  0x22   :  { %34 = dma.vmem_to_hbm [thread:$0]  %s32_s19, 256, %s127_s1, [#allocation4]  }
  0x23   :  { %88 = dma.done.wait [#allocation4], 256  }
  0x24   :  { %89 = vsyncadd [#allocation4], 4294967040 }
  0x25   :  { %38 = vsyncpa [#allocation3], 1 }
  0x26   :  { %39 = vsyncpa [#allocation4], 1 }

</bundles_post_ra>
